<compile_context>
chip_gen: v7x
topology: tpu7x:2x2x1
jax: 0.10.0
libtpu: 0.0.40
codegen_flags: <defaults>
</compile_context>

<pallas_src>
import functools

import jax
import jax.numpy as jnp
import numpy as np
from jax.experimental import pallas as pl
from jax.experimental.pallas import tpu as pltpu

LANES = 128            # lane tile (last dim)
MAX_BLOCK_ROWS = 1024  # (1024, 128) f32 = 512 KiB per input tile, ~2 MiB dbl-buffered
N_SPLIT = 2            # leading "parallel" axis (2 TCs on v7x; harmless on v5e/v6e)


def _cdiv(a, b):
    return -(-a // b)


def _int_pow(x, n):
    # n >= 1 small integer power via VPU multiplies (no EUP exp/log).
    y = x
    for _ in range(n - 1):
        y = y * x
    return y


def _focal_weight(x, gamma):
    g = float(gamma)
    if g == int(g) and 1 <= int(g) <= 8:
        return _int_pow(x, int(g))
    if g == 0.0:
        return jnp.ones_like(x)
    return x ** g  # non-integer gamma: fall back to pow (EUP)


def _focal_loss_kernel(pred_ref, mask_ref, out_ref, acc_ref, *,
                       gamma, alpha, n_total, block_rows, tiles_per_split):
    c = pl.program_id(0)          # parallel split index
    i = pl.program_id(1)          # sequential tile index within the split

    @pl.when(i == 0)
    def _():
        acc_ref[...] = jnp.zeros_like(acc_ref)

    p = jax.nn.sigmoid(pred_ref[...].astype(jnp.float32))
    m = mask_ref[...].astype(jnp.float32)

    # Padding mask rebuilt in-kernel: flat element index < n_total.
    row = jax.lax.broadcasted_iota(jnp.int32, (block_rows, LANES), 0)
    lane = jax.lax.broadcasted_iota(jnp.int32, (block_rows, LANES), 1)
    block_idx = c * tiles_per_split + i
    flat_idx = (block_idx * block_rows + row) * LANES + lane
    valid = (flat_idx < n_total).astype(jnp.float32)

    w_pos = _focal_weight(1.0 - p, gamma)
    w_neg = _focal_weight(p, gamma)
    loss_pos = (-alpha) * m * w_pos * jnp.log(p + 1e-12)
    loss_neg = (-(1.0 - alpha)) * (1.0 - m) * w_neg * jnp.log(1.0 - p + 1e-12)

    # loss_pos is already exactly zero on padding (mask is zero-padded); only
    # loss_neg needs explicit masking.  Accumulate as pure VALU adds.
    acc_ref[...] += loss_pos + loss_neg * valid

    @pl.when(i == pl.num_programs(1) - 1)
    def _():
        acc = acc_ref[...]
        # Fold sublane groups with elementwise adds (no cross-lane XLU work);
        # the final cross-lane sum of the tiny (N_SPLIT, 8, 128) output happens
        # once in the wrapper.
        partial = acc.reshape(block_rows // 8, 8, LANES).sum(axis=0)
        out_ref[0] = partial


def focal_loss(pred, mask, gamma=2.0, alpha=0.25):
    assert pred.shape == mask.shape, "pred and mask should have the same shape."
    n_total = int(np.prod(pred.shape))

    if not jnp.issubdtype(mask.dtype, jnp.floating):
        mask = mask.astype(jnp.float32)

    # Choose a tile: up to (MAX_BLOCK_ROWS, 128), rounded to a multiple of 8 rows.
    rows_needed = _cdiv(n_total, LANES)
    rows_per_split = _cdiv(rows_needed, N_SPLIT)
    block_rows = int(min(MAX_BLOCK_ROWS, max(8, _cdiv(rows_per_split, 8) * 8)))
    tiles_per_split = int(max(1, _cdiv(rows_per_split, block_rows)))
    rows_padded = N_SPLIT * tiles_per_split * block_rows
    pad = rows_padded * LANES - n_total

    pred2 = jnp.pad(pred.reshape(-1), (0, pad)).reshape(rows_padded, LANES)
    mask2 = jnp.pad(mask.reshape(-1), (0, pad)).reshape(rows_padded, LANES)

    kernel = functools.partial(
        _focal_loss_kernel,
        gamma=float(gamma), alpha=float(alpha), n_total=n_total,
        block_rows=block_rows, tiles_per_split=tiles_per_split,
    )

    in_spec = pl.BlockSpec((block_rows, LANES),
                           lambda c, i: (c * tiles_per_split + i, 0))
    out_spec = pl.BlockSpec((1, 8, LANES), lambda c, i: (c, 0, 0))

    partials = pl.pallas_call(
        kernel,
        out_shape=jax.ShapeDtypeStruct((N_SPLIT, 8, LANES), jnp.float32),
        grid_spec=pltpu.PrefetchScalarGridSpec(
            num_scalar_prefetch=0,
            grid=(N_SPLIT, tiles_per_split),
            in_specs=[in_spec, in_spec],
            out_specs=out_spec,
            scratch_shapes=[pltpu.VMEM((block_rows, LANES), jnp.float32)],
        ),
        compiler_params=pltpu.CompilerParams(
            dimension_semantics=("parallel", "arbitrary"),
        ),
    )(pred2, mask2)

    # num_pos + num_neg == numel by construction, so the denominator is constant.
    return jnp.sum(partials) / (jnp.float32(n_total) + jnp.float32(1e-12))


def _focal_loss_ref(pred, mask, gamma=2.0, alpha=0.25):
    p = jax.nn.sigmoid(pred.astype(jnp.float32))
    m = mask.astype(jnp.float32)
    num_pos = jnp.sum(m)
    num_neg = m.size - num_pos
    w_pos = (1.0 - p) ** gamma
    w_neg = p ** gamma
    loss_pos = -alpha * m * w_pos * jnp.log(p + 1e-12)
    loss_neg = -(1.0 - alpha) * (1.0 - m) * w_neg * jnp.log(1.0 - p + 1e-12)
    return (jnp.sum(loss_pos) + jnp.sum(loss_neg)) / (num_pos + num_neg + 1e-12)


if __name__ == "__main__":
    key = jax.random.PRNGKey(0)

    # Primary small test: pred/mask of shape [B, 1, H, W].
    k1, k2 = jax.random.split(key)
    B, C, H, W = 2, 1, 16, 16
    pred = jax.random.normal(k1, (B, C, H, W), dtype=jnp.float32)
    mask = jax.random.bernoulli(k2, p=0.3, shape=(B, C, H, W)).astype(jnp.float32)

    loss = focal_loss(pred, mask, gamma=2.0, alpha=0.25)
    loss = jax.block_until_ready(loss)
    ref = _focal_loss_ref(pred, mask, gamma=2.0, alpha=0.25)
    assert np.allclose(np.asarray(loss), np.asarray(ref), rtol=1e-4, atol=1e-6), (loss, ref)

    # Secondary test: odd size (padding mask) + multi-tile accumulation per split.
    k3, k4 = jax.random.split(k2)
    pred2 = jax.random.normal(k3, (5, 1, 237, 241), dtype=jnp.float32)
    mask2 = jax.random.bernoulli(k4, p=0.2, shape=(5, 1, 237, 241)).astype(jnp.float32)
    loss2 = jax.block_until_ready(focal_loss(pred2, mask2, gamma=2.0, alpha=0.25))
    ref2 = _focal_loss_ref(pred2, mask2, gamma=2.0, alpha=0.25)
    assert np.allclose(np.asarray(loss2), np.asarray(ref2), rtol=1e-4, atol=1e-6), (loss2, ref2)

    print("KERNEL_OK")
</pallas_src>

<mosaic_0001>
module attributes {stable_mosaic.version = 11 : i64} {
  func.func @_focal_loss_kernel(%arg0: i32, %arg1: i32, %arg2: memref<8x128xf32, #tpu.memory_space<vmem>>, %arg3: memref<8x128xf32, #tpu.memory_space<vmem>>, %arg4: memref<1x8x128xf32, #tpu.memory_space<vmem>>, %arg5: memref<8x128xf32, #tpu.memory_space<vmem>>) attributes {dimension_semantics = [#tpu.dimension_semantics<parallel>, #tpu.dimension_semantics<arbitrary>], iteration_bounds = array<i64: 2, 1>, scalar_prefetch = 0 : i64, scratch_operands = 1 : i64, tpu.core_type = #tpu.core_type<tc>, window_params = [{transform_indices = @transform_0, window_bounds = array<i64: 8, 128>}, {transform_indices = @transform_1, window_bounds = array<i64: 8, 128>}, {transform_indices = @transform_2, window_bounds = array<i64: 1, 8, 128>}]} {
    %c0_i32 = arith.constant 0 : i32
    %0 = arith.cmpi eq, %arg1, %c0_i32 : i32
    %1 = arith.extui %0 : i1 to i32
    %c0_i32_0 = arith.constant 0 : i32
    %2 = arith.cmpi ne, %1, %c0_i32_0 : i32
    scf.if %2 {
      %cst_17 = arith.constant 0.000000e+00 : f32
      %54 = vector.broadcast %cst_17 : f32 to vector<8x128xf32>
      %c0_18 = arith.constant 0 : index
      %c0_19 = arith.constant 0 : index
      %55 = vector.load %arg5[%c0_18, %c0_19] : memref<8x128xf32, #tpu.memory_space<vmem>>, vector<8x128xf32>
      tpu.vector_store %arg5[%c0_18, %c0_19], %54 {strides = array<i32>} : memref<8x128xf32, #tpu.memory_space<vmem>>, vector<8x128xf32>,
    } else {
    }
    %c0 = arith.constant 0 : index
    %c0_1 = arith.constant 0 : index
    %3 = vector.load %arg2[%c0, %c0_1] : memref<8x128xf32, #tpu.memory_space<vmem>>, vector<8x128xf32>
    %4 = arith.negf %3 : vector<8x128xf32>
    %5 = math.exp %4 : vector<8x128xf32>
    %cst = arith.constant 1.000000e+00 : f32
    %6 = vector.broadcast %cst : f32 to vector<8x128xf32>
    %7 = arith.addf %6, %5 : vector<8x128xf32>
    %8 = arith.divf %6, %7 : vector<8x128xf32>
    %c0_2 = arith.constant 0 : index
    %c0_3 = arith.constant 0 : index
    %9 = vector.load %arg3[%c0_2, %c0_3] : memref<8x128xf32, #tpu.memory_space<vmem>>, vector<8x128xf32>
    %10 = tpu.iota {dimensions = array<i32: 0>} : vector<8x128xi32>
    %11 = tpu.iota {dimensions = array<i32: 1>} : vector<8x128xi32>
    %c1_i32 = arith.constant 1 : i32
    %12 = arith.muli %arg0, %c1_i32 : i32
    %13 = arith.addi %12, %arg1 : i32
    %c8_i32 = arith.constant 8 : i32
    %14 = arith.muli %13, %c8_i32 : i32
    %15 = vector.broadcast %14 : i32 to vector<8x128xi32>
    %16 = arith.addi %15, %10 : vector<8x128xi32>
    %c128_i32 = arith.constant 128 : i32
    %17 = vector.broadcast %c128_i32 : i32 to vector<8x128xi32>
    %18 = arith.muli %16, %17 : vector<8x128xi32>
    %19 = arith.addi %18, %11 : vector<8x128xi32>
    %c512_i32 = arith.constant 512 : i32
    %20 = vector.broadcast %c512_i32 : i32 to vector<8x128xi32>
    %21 = arith.cmpi slt, %19, %20 : vector<8x128xi32>
    %22 = arith.extui %21 : vector<8x128xi1> to vector<8x128xi32>
    %23 = arith.sitofp %22 : vector<8x128xi32> to vector<8x128xf32>
    %cst_4 = arith.constant 1.000000e+00 : f32
    %24 = vector.broadcast %cst_4 : f32 to vector<8x128xf32>
    %25 = arith.subf %24, %8 : vector<8x128xf32>
    %26 = arith.mulf %25, %25 : vector<8x128xf32>
    %27 = arith.mulf %8, %8 : vector<8x128xf32>
    %cst_5 = arith.constant -2.500000e-01 : f32
    %28 = vector.broadcast %cst_5 : f32 to vector<8x128xf32>
    %29 = arith.mulf %28, %9 : vector<8x128xf32>
    %30 = arith.mulf %29, %26 : vector<8x128xf32>
    %cst_6 = arith.constant 9.99999996E-13 : f32
    %31 = vector.broadcast %cst_6 : f32 to vector<8x128xf32>
    %32 = arith.addf %8, %31 : vector<8x128xf32>
    %33 = math.log %32 : vector<8x128xf32>
    %34 = arith.mulf %30, %33 : vector<8x128xf32>
    %cst_7 = arith.constant 1.000000e+00 : f32
    %35 = vector.broadcast %cst_7 : f32 to vector<8x128xf32>
    %36 = arith.subf %35, %9 : vector<8x128xf32>
    %cst_8 = arith.constant -7.500000e-01 : f32
    %37 = vector.broadcast %cst_8 : f32 to vector<8x128xf32>
    %38 = arith.mulf %37, %36 : vector<8x128xf32>
    %39 = arith.mulf %38, %27 : vector<8x128xf32>
    %cst_9 = arith.constant 1.000000e+00 : f32
    %40 = vector.broadcast %cst_9 : f32 to vector<8x128xf32>
    %41 = arith.subf %40, %8 : vector<8x128xf32>
    %cst_10 = arith.constant 9.99999996E-13 : f32
    %42 = vector.broadcast %cst_10 : f32 to vector<8x128xf32>
    %43 = arith.addf %41, %42 : vector<8x128xf32>
    %44 = math.log %43 : vector<8x128xf32>
    %45 = arith.mulf %39, %44 : vector<8x128xf32>
    %c0_11 = arith.constant 0 : index
    %c0_12 = arith.constant 0 : index
    %46 = vector.load %arg5[%c0_11, %c0_12] : memref<8x128xf32, #tpu.memory_space<vmem>>, vector<8x128xf32>
    %47 = arith.mulf %45, %23 : vector<8x128xf32>
    %48 = arith.addf %34, %47 : vector<8x128xf32>
    %49 = arith.addf %46, %48 : vector<8x128xf32>
    %c0_13 = arith.constant 0 : index
    %c0_14 = arith.constant 0 : index
    %50 = vector.load %arg5[%c0_13, %c0_14] : memref<8x128xf32, #tpu.memory_space<vmem>>, vector<8x128xf32>
    tpu.vector_store %arg5[%c0_13, %c0_14], %49 {strides = array<i32>} : memref<8x128xf32, #tpu.memory_space<vmem>>, vector<8x128xf32>,
    %c0_i32_15 = arith.constant 0 : i32
    %51 = arith.cmpi eq, %arg1, %c0_i32_15 : i32
    %52 = arith.extui %51 : i1 to i32
    %c0_i32_16 = arith.constant 0 : i32
    %53 = arith.cmpi ne, %52, %c0_i32_16 : i32
    scf.if %53 {
      %c0_17 = arith.constant 0 : index
      %c0_18 = arith.constant 0 : index
      %54 = vector.load %arg5[%c0_17, %c0_18] : memref<8x128xf32, #tpu.memory_space<vmem>>, vector<8x128xf32>
      %55 = vector.shape_cast %54 : vector<8x128xf32> to vector<1x8x128xf32>
      %cst_19 = arith.constant dense<0.000000e+00> : vector<8x128xf32>
      %56 = vector.multi_reduction <add>, %55, %cst_19 [0] : vector<1x8x128xf32> to vector<8x128xf32>
      %c0_20 = arith.constant 0 : index
      %c0_21 = arith.constant 0 : index
      %c0_22 = arith.constant 0 : index
      %57 = vector.load %arg4[%c0_20, %c0_21, %c0_22] : memref<1x8x128xf32, #tpu.memory_space<vmem>>, vector<1x8x128xf32>
      %58 = vector.shape_cast %57 : vector<1x8x128xf32> to vector<8x128xf32>
      %59 = vector.shape_cast %56 : vector<8x128xf32> to vector<1x8x128xf32>
      tpu.vector_store %arg4[%c0_20, %c0_21, %c0_22], %59 {strides = array<i32>} : memref<1x8x128xf32, #tpu.memory_space<vmem>>, vector<1x8x128xf32>,
    } else {
    }
    return
  }
  func.func @transform_0(%arg0: i32, %arg1: i32) -> (i32, i32) {
    %c1_i32 = arith.constant 1 : i32
    %0 = arith.muli %arg0, %c1_i32 : i32
    %1 = arith.addi %0, %arg1 : i32
    %c0_i32 = arith.constant 0 : i32
    %c0_i32_0 = arith.constant 0 : i32
    return %1, %c0_i32 : i32, i32
  }
  func.func @transform_1(%arg0: i32, %arg1: i32) -> (i32, i32) {
    %c1_i32 = arith.constant 1 : i32
    %0 = arith.muli %arg0, %c1_i32 : i32
    %1 = arith.addi %0, %arg1 : i32
    %c0_i32 = arith.constant 0 : i32
    %c0_i32_0 = arith.constant 0 : i32
    return %1, %c0_i32 : i32, i32
  }
  func.func @transform_2(%arg0: i32, %arg1: i32) -> (i32, i32, i32) {
    %c0_i32 = arith.constant 0 : i32
    %c0_i32_0 = arith.constant 0 : i32
    %c0_i32_1 = arith.constant 0 : i32
    return %arg0, %c0_i32, %c0_i32_0 : i32, i32, i32
  }
}

</mosaic_0001>

<bundles_post_ra>
// kernel: tpu_custom_call.1
= control target key start
LH: loop header
LB: loop body
LE: loop exit
PB: predicated region body
PF: predicated region fallthrough
CT: control target
= control target key end

     0   :  { %7 = vsyncpa [#allocation4], 0  ;;  %s874_s0 = inlined_call_operand.hbm [shape: f32[16,128], index: 0, kind: input, shape index: {}]   ;;  %s875_s1 = inlined_call_operand.hbm [shape: f32[16,128], index: 1, kind: input, shape index: {}]   ;;  %s876_s2 = inlined_call_operand.hbm [shape: f32[2,8,128], index: 2, kind: output, shape index: {}]  }
   0x1   :  { %9 = vsyncpa [#allocation4 + $0x1], 0 }
   0x2   :  { %10 = vsyncpa [#allocation7], 0 }
   0x3   :  { %12 = vsyncpa [#allocation7 + $0x1], 0 }
   0x4   :  { %13 = vsyncpa [#allocation5], 0 }
   0x5   :  { %15 = vsyncpa [#allocation5 + $0x1], 0  ;;  %s648_s9 = smov 0   ;;  %s650_s10 = smov 0  }
   0x6   :  { %s652_s11 = smov 0   ;;  %s654_s12 = smov 0  }
   0x7   :  { %s656_s13 = smov 0   ;;  %s658_s14 = smov 0  }
   0x8 LB: > { %s386_s15 = sadd.s32 4294967295, %s627_s14   ;;  %s387_s16 = sadd.s32 4294967294, %s627_s14   ;;  %s627_s14 = sphi %s658_s14, %s21_s14   ;;  %s623_s13 = sphi %s656_s13, %s896_s13   ;;  %s619_s12 = sphi %s654_s12, %s895_s12   ;;  %s615_s11 = sphi %s652_s11, %s894_s11   ;;  %s611_s10 = sphi %s650_s10, %s893_s10   ;;  %s607_s9 = sphi %s648_s9, %s892_s9  }
   0x9   : > { %s33_s17 = sadd.s32 1, %s623_s13  ;;  %s42_s18 = sadd.s32 1, %s615_s11 }
   0xa   : > { %p35_p0 = scmp.ge.s32.totalorder %s33_s17, 2  ;;  %p49_p1 = scmp.ne.s32.totalorder %s615_s11, %s611_s10 }
   0xb   : > { %p50_p2 = scmp.eq.s32.totalorder %s627_s14, 0  ;;  %p55_p3 = scmp.ne.s32.totalorder %s611_s10, %s607_s9 }
   0xc   : > { %s898_s17 = smov (%p35_p0, %s33_s17), 0  ;;  %p56_p5 = scmp.eq.s32.totalorder %s386_s15, 0 }
   0xd   : > { %p689_p4 = por %p50_p2, %p49_p1  ;;  %s39_s20 = ssub.s32 %s623_s13, %s898_s17 }
   0xe   : > { %p107_p6 = scmp.eq.s32.totalorder %s386_s15, 1  ;;  %p40_p7 = scmp.eq.s32.totalorder %s39_s20, 0 }
   0xf   : > { %p695_p8 = por %p56_p5, %p55_p3  ;;  %p113_p10 = scmp.eq.s32.totalorder %s387_s16, 1 }
  0x10   : > { %p699_p9 = por %p107_p6, %p49_p1  ;;  %p422_p13 = scmp.lt.s32.totalorder %s627_s14, 2 }
  0x11   : > { %s880_s21 = scalar_select %p695_p8, 1, 0 }
  0x12   : > { %s881_s22 = scalar_select %p699_p9, 1, 0 }
  0x13   : > { %s704_s23 = scalar_select %p40_p7, %s615_s11, %s42_s18  }
  0x14   : > { %p706_p11 = por %p113_p10, %p55_p3  ;;  %s713_s25 = sand.u32 1, %s615_s11  }
  0x15   : > { %s390_s26 = sshll.u32 %s713_s25, 3  ;;  %s391_s27 = sshll.u32 %s623_s13, 7 }
  0x16   : > { %s882_s24 = scalar_select %p706_p11, 1, 0 }
  0x17   : > { %s722_s30 = scalar_lea.hbm %s874_s0, %s391_s27  ;;  %s137_s3 = scalar_lea.vmem [#allocation3], %s390_s26 }
  0x18   : > { %s145_s4 = sshll.u32 %s137_s3, 4  ;;  %p730_p0 = pnand %p422_p13, %p689_p4  ;;  %s726_s4 = int_to_ptr.vmem [resolvable:$true] %s145_s4 }
  0x19   : > { %s134_s6 = scalar_lea.sflag [#allocation4], %s713_s25  ;;  %s481_s7 = scalar_lea.hbm %s722_s30, 128 }
  0x1a   : > { %p482_p3 = scmp.ne.s32.totalorder %s722_s30, %s481_s7  ;;  %p483_p5 = pneg %p730_p0 }
  0x1b   : > { %s486_s16 = scalar_lea.hbm %s874_s0, 256  ;;  %p487_p4 = scmp.lt.u32.totalorder %s722_s30, %s874_s0 }
  0x1c   : > { %p484_p6 = pnand %p483_p5, %p482_p3  ;;  %p488_p10 = scmp.lt.u32.totalorder %s486_s16, %s481_s7 }
  0x1d   : > { %p490_p12 = scmp.lt.u32.totalorder %s481_s7, %s722_s30 }
  0x1e   : > { %p485_p7 = pneg %p484_p6  ;;  %p489_p13 = por %p488_p10, %p487_p4 }
  0x20   : > { %p491_p1 = por %p490_p12, %p489_p13 }
  0x22   : > { %p492_p2 = pnand %p491_p1, %p485_p7 }
  0x24   : > { %495 = shalt.err (!%p492_p2)
}
  0x25   : > { %s496_s20 = scalar_lea.vmem %s726_s4, 128  ;;  %s629_s28 = smov [#allocation3]  }
  0x26   : > { %p497_p3 = scmp.ne.s32.totalorder %s726_s4, %s496_s20  ;;  %s501_s29 = sshll.u32 %s629_s28, 4  ;;  %s502_s29 = int_to_ptr.vmem [resolvable:$false] %s501_s29 }
  0x27   : > { %s503_s3 = scalar_lea.vmem %s502_s29, 256  ;;  %p504_p9 = scmp.lt.s32.totalorder %s726_s4, %s502_s29 }
  0x28   : > { %p499_p6 = pnand %p497_p3, %p483_p5  ;;  %p505_p4 = scmp.lt.s32.totalorder %s503_s3, %s496_s20 }
  0x2a   : > { %p500_p11 = pneg %p499_p6  ;;  %p506_p10 = por %p505_p4, %p504_p9 }
  0x2c   : > { %p507_p12 = pnand %p506_p10, %p500_p11 }
  0x2e   : > { %510 = shalt.err (!%p507_p12)
}
  0x2f   : > { %414 = dma.hbm_to_vmem [thread:$0]  (!%p730_p0), %s722_s30, 128, %s726_s4, %s134_s6  }
  0x30   : > { %p884_p1 = scmp.lt.s32.totalorder %s627_s14, 3  ;;  %p885_p2 = scmp.ge.s32.totalorder %s627_s14, 1 }
  0x31   : > { %s775_s16 = scalar_lea.hbm %s875_s1, %s391_s27  ;;  %s156_s18 = scalar_lea.vmem [#allocation6], %s390_s26 }
  0x32   : > { %p766_p7 = pnand %p885_p2, %p884_p1  ;;  %s164_s19 = sshll.u32 %s156_s18, 4  ;;  %s165_s19 = int_to_ptr.vmem [resolvable:$true] %s164_s19 }
  0x33   : > { %s153_s30 = scalar_lea.sflag [#allocation7], %s713_s25  ;;  %s511_s4 = scalar_lea.hbm %s775_s16, 128 }
  0x34   : > { %s886_s7 = scalar_select %p766_p7, 1, 0 }
  0x35   : > { %p512_p9 = scmp.ne.s32.totalorder %s775_s16, %s511_s4  ;;  %s516_s27 = scalar_lea.hbm %s875_s1, 256 }
  0x36   : > { %p517_p3 = scmp.lt.u32.totalorder %s775_s16, %s875_s1  ;;  %p518_p6 = scmp.lt.u32.totalorder %s516_s27, %s511_s4 }
  0x37   : > { %p514_p11 = pnand %p512_p9, %p483_p5  ;;  %p520_p10 = scmp.lt.u32.totalorder %s511_s4, %s775_s16 }
  0x38   : > { %p519_p4 = por %p518_p6, %p517_p3 }
  0x39   : > { %p515_p13 = pneg %p514_p11 }
  0x3a   : > { %p521_p12 = por %p520_p10, %p519_p4 }
  0x3c   : > { %p522_p1 = pnand %p521_p12, %p515_p13 }
  0x3e   : > { %525 = shalt.err (!%p522_p1)
}
  0x3f   : > { %s526_s25 = scalar_lea.vmem %s165_s19, 128  ;;  %s630_s26 = smov [#allocation6]  }
  0x40   : > { %p527_p2 = scmp.ne.s32.totalorder %s165_s19, %s526_s25  ;;  %s531_s3 = sshll.u32 %s630_s26, 4  ;;  %s532_s3 = int_to_ptr.vmem [resolvable:$false] %s531_s3 }
  0x41   : > { %s533_s8 = scalar_lea.vmem %s532_s3, 256  ;;  %p534_p8 = scmp.lt.s32.totalorder %s165_s19, %s532_s3 }
  0x42   : > { %p529_p9 = pnand %p527_p2, %p483_p5  ;;  %p535_p7 = scmp.lt.s32.totalorder %s533_s8, %s526_s25 }
  0x44   : > { %p530_p11 = pneg %p529_p9  ;;  %p536_p3 = por %p535_p7, %p534_p8 }
  0x46   : > { %p537_p6 = pnand %p536_p3, %p530_p11 }
  0x48   : > { %540 = shalt.err (!%p537_p6)
}
  0x49   : > { %417 = dma.hbm_to_vmem [thread:$0]  (!%p730_p0), %s775_s16, 128, %s165_s19, %s153_s30  }
  0x4a   : > { %p887_p13 = scmp.ne.s32.totalorder %s886_s7, 0 }
  0x4b   : > { %s802_s15 = sand.u32 (!%p887_p13), 1, %s611_s10   ;;  %p888_p8 = scmp.ne.s32.totalorder (!%p887_p13), %s880_s21, 0 }
  0x4c   : > { %173 = sbr.rel (%p887_p13) target bundleno = 150 (0x96), region = 28  ;;  %s805_s18 = sshll.u32 (!%p887_p13), %s802_s15, 3 }
  0x4d   : > { %s176_s4 = scalar_lea.sflag (!%p887_p13), [#allocation4], %s802_s15  ;;  %s179_s6 = scalar_lea.vmem (!%p887_p13), [#allocation3], %s805_s18 }
  0x53   : > { %594 = dma.done.wait (%p888_p8), %s176_s4, 128  }
  0x54   : > { %596 = vsyncadd (%p888_p8), %s176_s4, 4294967168  ;;  %s185_s5 = scalar_lea.sflag [#allocation7], %s802_s15  ;;  %s188_s7 = scalar_lea.vmem [#allocation6], %s805_s18 }
  0x55   : > { %598 = dma.done.wait (%p888_p8), %s185_s5, 128  }
  0x56   : > { %600 = vsyncadd (%p888_p8), %s185_s5, 4294967168  ;;  %v221_v0 = vld [vmem:[%s179_s6] sm:$0xff]  ;;  %v229_v4 = vlaneseq  ;;  %s399_s16 = sshll.u32 %s619_s12, 3  ;;  %v228_v11 = vld [vmem:[%s188_s7] sm:$0xff]  ;;  %v631_v27 = vmov 0.0   ;;  %s213_s21 = scalar_lea.vmem [#allocation8], %s805_s18 }
  0x57   : > { %v398_v1 = vmul.f32 -1.442695, %v221_v0  ;;  %v235_v6 = vstv %s399_s16  ;;  %v251_v15 = vsub.f32 1.0, %v228_v11  ;;  %v245_v19 = vmul.f32 -0.25, %v228_v11  ;;  %s283_s19 = sshll.u32 %s213_s21, 4  ;;  %s402_s30 = sshll.u32 %s619_s12, 7  ;;  %s822_s19 = int_to_ptr.vmem [resolvable:$true] %s283_s19 }
  0x58   : > { %v230_v5 = vshrl.u32 %v229_v4, 7  ;;  %v232_v13 = vand.u32 127, %v229_v4  ;;  %s827_s28 = scalar_lea.hbm %s876_s2, %s402_s30  ;;  %s270_s29 = scalar_lea.sflag [#allocation5], %s802_s15 }
  0x59   : > { %473 = vpow2.f32 %v398_v1  ;;  %v252_v20 = vmul.f32 -0.75, %v251_v15  ;;  %s541_s25 = scalar_lea.vmem %s822_s19, 128  ;;  %p889_p5 = scmp.ne.s32.totalorder %s881_s22, 0 }
  0x5a   : > { %v236_v8 = vadd.s32 %v235_v6, %v230_v5  ;;  %p542_p0 = scmp.ne.s32.totalorder %s822_s19, %s541_s25  ;;  %s632_s12 = smov [#allocation8]  }
  0x5b   : > { %s545_s26 = sshll.u32 %s632_s12, 4  ;;  %s546_s26 = int_to_ptr.vmem [resolvable:$false] %s545_s26 }
  0x5c   : > { %v237_v14 = vmul.u32 128, %v236_v8  ;;  %p543_p7 = pnand %p542_p0, %p889_p5  ;;  %s547_s3 = scalar_lea.vmem %s546_s26, 256 }
  0x5d   : > { %p548_p10 = scmp.lt.s32.totalorder %s822_s19, %s546_s26  ;;  %p549_p12 = scmp.lt.s32.totalorder %s547_s3, %s541_s25 }
  0x5e   : > { %v238_v16 = vadd.s32 %v237_v14, %v232_v13  ;;  %p544_p4 = pneg %p543_p7 }
  0x5f   : > { %p550_p1 = por %p549_p12, %p548_p10 }
  0x60   : > { %vm239_vm0 = vcmp.lt.s32.totalorder %v238_v16, 512 }
  0x61   : > { %v400_v28 = vsel %vm239_vm0, 1.0, %v631_v27  ;;  %p551_p2 = pnand %p550_p1, %p544_p4 }
  0x63   : > { %v474_v2 = vpop.eup %473 }
  0x64   : > { %v225_v3 = vadd.f32 1.0, %v474_v2 }
  0x66   : > { %475 = vrcp.f32 %v225_v3 }
  0x70   : > { %v476_v7 = vpop.eup %475 }
  0x71   : > { %v242_v9 = vsub.f32 1.0, %v476_v7  ;;  %v247_v10 = vadd.f32 1e-12, %v476_v7  ;;  %v244_v18 = vmul.f32 %v476_v7, %v476_v7 }
  0x73   : > { %477 = vlog2.f32 %v247_v10  ;;  %v254_v12 = vadd.f32 1e-12, %v242_v9  ;;  %v243_v17 = vmul.f32 %v242_v9, %v242_v9  ;;  %v253_v24 = vmul.f32 %v252_v20, %v244_v18 }
  0x75   : > { %479 = vlog2.f32 %v254_v12  ;;  %v246_v22 = vmul.f32 %v245_v19, %v243_v17 }
  0x7d   : > { %v478_v21 = vpop.eup %477 }
  0x7e   : > { %v249_v23 = vmul.f32 0.6931472, %v478_v21 }
  0x7f   : > { %v480_v25 = vpop.eup %479 }
  0x80   : > { %v256_v26 = vmul.f32 0.6931472, %v480_v25  ;;  %v250_v29 = vmul.f32 %v249_v23, %v246_v22 }
  0x82   : > { %v257_v30 = vmul.f32 %v256_v26, %v253_v24 }
  0x84   : > { %v259_v31 = vmul.f32 %v400_v28, %v257_v30 }
  0x86   : > { %v260_v32 = vadd.f32 %v259_v31, %v250_v29 }
  0x88   : > { %268 = vst [vmem:[%s213_s21] sm:$0xff] %v260_v32 }
  0x89   : > { %554 = shalt.err (!%p551_p2)
}
  0x8a   : > { %s555_s8 = scalar_lea.hbm %s827_s28, 128  ;;  %s559_s4 = scalar_lea.hbm %s876_s2, 256 }
  0x8b   : > { %p556_p9 = scmp.ne.s32.totalorder %s827_s28, %s555_s8  ;;  %p560_p6 = scmp.lt.u32.totalorder %s827_s28, %s876_s2 }
  0x8c   : > { %p561_p13 = scmp.lt.u32.totalorder %s559_s4, %s555_s8  ;;  %p563_p0 = scmp.lt.u32.totalorder %s555_s8, %s827_s28 }
  0x8d   : > { %p557_p11 = pnand %p556_p9, %p889_p5 }
  0x8e   : > { %p562_p8 = por %p561_p13, %p560_p6 }
  0x8f   : > { %p558_p3 = pneg %p557_p11 }
  0x90   : > { %p564_p7 = por %p563_p0, %p562_p8 }
  0x92   : > { %p565_p4 = pnand %p564_p7, %p558_p3 }
  0x94   : > { %568 = shalt.err (!%p565_p4)
}
  0x95   : > { %409 = dma.vmem_to_hbm [thread:$0]  (%p889_p5), %s822_s19, 128, %s827_s28, %s270_s29  }
  0x96 PF: > { %s295_s7 = sand.u32 1, %s607_s9   ;;  %p890_p10 = scmp.ne.s32.totalorder %s882_s24, 0 }
  0x97   : > { %p891_p12 = scmp.ge.s32.totalorder %s627_s14, 2  ;;  %s296_s16 = scalar_lea.sflag [#allocation5], %s295_s7 }
  0x99   : > { %p419_p1 = pnand %p891_p12, %p890_p10 }
  0x9b   : > { %602 = dma.done.wait (!%p419_p1), %s296_s16, 128  }
  0x9c   : > { %604 = vsyncadd (!%p419_p1), %s296_s16, 4294967168  ;;  %s21_s14 = sadd.s32 1, %s627_s14   ;;  %s892_s9 = smov %s611_s10 }
  0x9d   : > { %p18_p2 = scmp.ge.s32.totalorder %s21_s14, 4   ;;  %s893_s10 = smov %s615_s11 }
  0x9e   : > { %s894_s11 = smov %s704_s23  ;;  %s895_s12 = smov %s623_s13 }
  0x9f   : > { %s896_s13 = smov %s898_s17  ;;  %20 = sbr.rel (!%p18_p2) target bundleno = 8 (0x8), region = 94 }
  0xa6   :  { %301 = vsyncpa [#allocation4], 1 }
  0xa7   :  { %303 = vsyncpa [#allocation4 + $0x1], 1 }
  0xa8   :  { %304 = vsyncpa [#allocation7], 1 }
  0xa9   :  { %306 = vsyncpa [#allocation7 + $0x1], 1 }
  0xaa   :  { %307 = vsyncpa [#allocation5], 1 }
  0xab   :  { %309 = vsyncpa [#allocation5 + $0x1], 1 }

</bundles_post_ra>
